<compile_context>
chip_gen: v5e
topology: v5e:2x2
jax: 0.10.0
libtpu: 0.0.40
codegen_flags: <defaults>
</compile_context>

<pallas_src>
import numpy as np
import jax
import jax.numpy as jnp
from jax import lax
from jax.experimental import pallas as pl
from jax.experimental.pallas import tpu as pltpu


def particular_kernel(x_ref,
                      w1_ref, b1_ref,
                      w2_ref, b2_ref,
                      w3_ref, b3_ref,
                      w4t_ref, b4_ref,
                      o_ref):
    """One batch tile.

    x_ref : (tile_n, D_in)   native batch-major input block (no wrapper transpose)
    w*    : torch convention (out, in); biases (out, 1); w4t pre-transposed (H, D_out)
    o_ref : (D_out, tile_n)  feature-major, lane-dense output block
    """
    d_out = o_ref.shape[0]
    x = x_ref[...]                                         # (T, D_in)

    # ---- layer 1: contract the tiny D_in axis directly against the native
    # batch-major x block (A @ B.T form) -> feature-major (H, T).  This is where
    # the sublane->lane relayout of x happens (MXU transposed weight-push path),
    # replacing the old wrapper-side transpose + pad kernels entirely.
    z1 = lax.dot_general(w1_ref[...], x, (((1,), (1,)), ((), ())),
                         preferred_element_type=jnp.float32) + b1_ref[...]
    h1 = jnp.tanh(z1)                                      # (H, T), lane-dense

    # ---- layers 2/3: feature-major (H,H) @ (H,T) MXU matmuls.
    h2 = jnp.tanh(jnp.dot(w2_ref[...], h1,
                          preferred_element_type=jnp.float32) + b2_ref[...])
    h3 = jnp.tanh(jnp.dot(w3_ref[...], h2,
                          preferred_element_type=jnp.float32) + b3_ref[...])

    # ---- layer 4: M = D_out = 2 rows would be almost pure MXU fill/drain.
    # Do it on the VPU (lane-broadcast multiply) + XLU (sublane reduce) instead;
    # those slots have slack.  Exact f32 math.
    if d_out <= 8:
        w4t = w4t_ref[...]                                 # (H, D_out)
        for o in range(d_out):                             # static unroll
            y_o = jnp.sum(w4t[:, o:o + 1] * h3, axis=0, keepdims=True) \
                  + b4_ref[o:o + 1, :]                     # (1, T)
            o_ref[o:o + 1, :] = y_o.astype(o_ref.dtype)
    else:                                                  # generic fallback
        y = lax.dot_general(w4t_ref[...], h3, (((0,), (0,)), ((), ())),
                            preferred_element_type=jnp.float32) + b4_ref[...]
        o_ref[...] = y.astype(o_ref.dtype)


def _choose_tile(n_rows, max_tile=8192):
    """Lane-dense batch tile (multiple of 128).

    Grow the tile to amortize the ~0.35us per grid-step pipeline overhead, but
    keep at least 2 grid steps whenever N > 128 so the 'parallel' batch axis can
    be split across a 2-TensorCore chip (v7x); cap at 8192 (total VMEM residency
    stays well under the 32 MiB scoped default on every generation).
    """
    t = 128
    while t < max_tile and t * 2 < n_rows:
        t *= 2
    return t


def prepare_params(raw_params, scale):
    """One-time parameter preparation (call once, off the per-call hot path).

    Folds s = n*a1 into weights/biases: s*(Wx+b) == (sW)x + (sb).  Exact here
    because s == 1.0 in f32; for general s this changes rounding order by ~1 ulp
    (if strict parity mattered, multiply by s in-kernel via an SMEM scalar
    instead).  Also pre-transposes W4 to (H, D_out) for the VPU layer-4 path.
    """
    w1, b1, w2, b2, w3, b3, w4, b4 = raw_params
    s = scale[0]
    fold = lambda w, b: (s * w, s * b)
    w1, b1 = fold(w1, b1)
    w2, b2 = fold(w2, b2)
    w3, b3 = fold(w3, b3)
    w4, b4 = fold(w4, b4)
    return (w1, b1, w2, b2, w3, b3, w4.T, b4)


def _particular_forward_impl(x, prepared, tile_n=None):
    """x: (N, D_in) row-major (PyTorch convention). Returns (N, D_out)."""
    w1, b1, w2, b2, w3, b3, w4t, b4 = prepared
    n_rows, d_in = x.shape
    h = w1.shape[0]
    d_out = w4t.shape[1]

    if tile_n is None:
        tile_n = _choose_tile(n_rows)
    assert tile_n % 128 == 0, "batch tile must be a multiple of 128 lanes"
    n_tiles = pl.cdiv(n_rows, tile_n)          # non-divisible last block is OK

    layer_flops = d_in * h + 2 * h * h + h * d_out
    cost = pl.CostEstimate(
        flops=2 * n_rows * layer_flops,
        transcendentals=3 * h * n_rows,
        bytes_accessed=4 * (n_rows * (d_in + d_out) + layer_flops + 3 * h + d_out),
    )

    resident = lambda shape: pl.BlockSpec(shape, lambda i: (0, 0))

    out_fm = pl.pallas_call(
        particular_kernel,
        out_shape=jax.ShapeDtypeStruct((d_out, n_rows), jnp.float32),
        grid=(n_tiles,),
        in_specs=[
            pl.BlockSpec((tile_n, d_in), lambda i: (i, 0)),   # streamed x tile
            resident((h, d_in)),  resident((h, 1)),           # W1, b1 (resident)
            resident((h, h)),     resident((h, 1)),           # W2, b2
            resident((h, h)),     resident((h, 1)),           # W3, b3
            resident((h, d_out)), resident((d_out, 1)),       # W4^T, b4
        ],
        out_specs=pl.BlockSpec((d_out, tile_n), lambda i: (0, i)),
        compiler_params=pltpu.CompilerParams(
            dimension_semantics=("parallel",)),               # megacore on v7x
        cost_estimate=cost,
    )(x, w1, b1, w2, b2, w3, b3, w4t, b4)

    # Single tiny (D_out, N) -> (N, D_out) transpose; fused into the same jitted
    # program (one dispatch per call), keeping the Pallas stores lane-dense.
    return out_fm.T


# One executable per (shape, tile) -- no per-call Python/XLA prep ops.
particular_forward = jax.jit(_particular_forward_impl, static_argnames=("tile_n",))


def init_params(key, d_in, h, d_out):
    """Deterministic init mirroring the PyTorch __init__ (normal weights/biases).
    Weights in torch convention (out, in); biases (out, 1)."""
    ks = jax.random.split(key, 8)

    def w(k, fan_in, fan_out):
        std = np.sqrt(2.0 / (fan_in + fan_out))
        return std * jax.random.normal(k, (fan_out, fan_in), jnp.float32)

    def b(k, fan_out):
        return jax.random.normal(k, (fan_out, 1), jnp.float32)  # std = 1

    return (w(ks[0], d_in, h),  b(ks[1], h),
            w(ks[2], h, h),     b(ks[3], h),
            w(ks[4], h, h),     b(ks[5], h),
            w(ks[6], h, d_out), b(ks[7], d_out))


def reference_forward(x, raw_params, scale):
    """Pure-JAX reference in the original torch ordering: s * (xW^T + b)."""
    w1, b1, w2, b2, w3, b3, w4, b4 = raw_params
    s = scale[0]
    y1 = jnp.tanh(s * (x @ w1.T + b1.T))
    y2 = jnp.tanh(s * (y1 @ w2.T + b2.T))
    y3 = jnp.tanh(s * (y2 @ w3.T + b3.T))
    return s * (y3 @ w4.T + b4.T)


if __name__ == "__main__":
    D_in, H, D_out = 2, 32, 2          # particular(D_in, H, D_out)

    key = jax.random.PRNGKey(0)
    k_params, _ = jax.random.split(key)
    raw_params = init_params(k_params, D_in, H, D_out)

    a1 = jnp.float32(0.1)
    n = jnp.float32(1.0) / a1
    scale = jnp.array([n * a1], dtype=jnp.float32)   # == 1.0 exactly in f32

    prepared = prepare_params(raw_params, scale)     # one-time, off the hot path

    # Case 1: CENN crack boundary points x = 0, y = linspace(-1, 1, 101)
    #         -> single 128-lane tile with a ragged (masked) tail.
    N_test = 101
    xy = jnp.stack([jnp.zeros(N_test, jnp.float32),
                    jnp.linspace(-1.0, 1.0, N_test, dtype=jnp.float32)], axis=1)
    out = jax.block_until_ready(particular_forward(xy, prepared))
    ref = reference_forward(xy, raw_params, scale)
    np.testing.assert_allclose(np.asarray(out), np.asarray(ref),
                               rtol=1e-5, atol=1e-5)

    # Case 2: N = 1000 -> tile 512, 2 grid steps (megacore split + ragged tail,
    #         no wrapper-side padding).
    x2 = jax.random.uniform(jax.random.PRNGKey(1), (1000, D_in), jnp.float32,
                            minval=-1.0, maxval=1.0)
    out2 = jax.block_until_ready(particular_forward(x2, prepared))
    ref2 = reference_forward(x2, raw_params, scale)
    np.testing.assert_allclose(np.asarray(out2), np.asarray(ref2),
                               rtol=1e-5, atol=1e-5)

    # Case 3: N = 5000 -> tile 2048, 3 grid steps (2 full + 1 ragged).
    x3 = jax.random.uniform(jax.random.PRNGKey(2), (5000, D_in), jnp.float32,
                            minval=-1.0, maxval=1.0)
    out3 = jax.block_until_ready(particular_forward(x3, prepared))
    ref3 = reference_forward(x3, raw_params, scale)
    np.testing.assert_allclose(np.asarray(out3), np.asarray(ref3),
                               rtol=1e-5, atol=1e-5)

    print("KERNEL_OK")
</pallas_src>

<mosaic_0001>
module attributes {stable_mosaic.version = 11 : i64} {
  func.func @particular_kernel(%arg0: i32, %arg1: memref<128x2xf32, #tpu.memory_space<vmem>>, %arg2: memref<32x2xf32, #tpu.memory_space<vmem>>, %arg3: memref<32x1xf32, #tpu.memory_space<vmem>>, %arg4: memref<32x32xf32, #tpu.memory_space<vmem>>, %arg5: memref<32x1xf32, #tpu.memory_space<vmem>>, %arg6: memref<32x32xf32, #tpu.memory_space<vmem>>, %arg7: memref<32x1xf32, #tpu.memory_space<vmem>>, %arg8: memref<32x2xf32, #tpu.memory_space<vmem>>, %arg9: memref<2x1xf32, #tpu.memory_space<vmem>>, %arg10: memref<2x128xf32, #tpu.memory_space<vmem>>) attributes {dimension_semantics = [#tpu.dimension_semantics<parallel>], iteration_bounds = array<i64: 1>, scalar_prefetch = 0 : i64, scratch_operands = 0 : i64, tpu.core_type = #tpu.core_type<tc>, window_params = [{transform_indices = @transform_0, window_bounds = array<i64: 128, 2>}, {pipeline_mode = #tpu.pipeline_mode<synchronous>, transform_indices = @transform_1, window_bounds = array<i64: 32, 2>}, {pipeline_mode = #tpu.pipeline_mode<synchronous>, transform_indices = @transform_2, window_bounds = array<i64: 32, 1>}, {pipeline_mode = #tpu.pipeline_mode<synchronous>, transform_indices = @transform_3, window_bounds = array<i64: 32, 32>}, {pipeline_mode = #tpu.pipeline_mode<synchronous>, transform_indices = @transform_4, window_bounds = array<i64: 32, 1>}, {pipeline_mode = #tpu.pipeline_mode<synchronous>, transform_indices = @transform_5, window_bounds = array<i64: 32, 32>}, {pipeline_mode = #tpu.pipeline_mode<synchronous>, transform_indices = @transform_6, window_bounds = array<i64: 32, 1>}, {pipeline_mode = #tpu.pipeline_mode<synchronous>, transform_indices = @transform_7, window_bounds = array<i64: 32, 2>}, {pipeline_mode = #tpu.pipeline_mode<synchronous>, transform_indices = @transform_8, window_bounds = array<i64: 2, 1>}, {transform_indices = @transform_9, window_bounds = array<i64: 2, 128>}]} {
    %c0 = arith.constant 0 : index
    %c0_0 = arith.constant 0 : index
    %0 = vector.load %arg1[%c0, %c0_0] : memref<128x2xf32, #tpu.memory_space<vmem>>, vector<128x2xf32>
    %c0_1 = arith.constant 0 : index
    %c0_2 = arith.constant 0 : index
    %1 = vector.load %arg2[%c0_1, %c0_2] : memref<32x2xf32, #tpu.memory_space<vmem>>, vector<32x2xf32>
    %cst = arith.constant dense<0.000000e+00> : vector<32x128xf32>
    %2 = tpu.matmul %1, %0, %cst {dimension_numbers = #tpu.dot_dimension_numbers<[1], [1], [0], [0], [0, 0, 1, 0], [], []>} : vector<32x2xf32>, vector<128x2xf32>, vector<32x128xf32> -> vector<32x128xf32>
    %c0_3 = arith.constant 0 : index
    %c0_4 = arith.constant 0 : index
    %3 = vector.load %arg3[%c0_3, %c0_4] : memref<32x1xf32, #tpu.memory_space<vmem>>, vector<32x1xf32>
    %4 = vector.broadcast %3 : vector<32x1xf32> to vector<32x128xf32>
    %5 = arith.addf %2, %4 : vector<32x128xf32>
    %6 = math.tanh %5 : vector<32x128xf32>
    %c0_5 = arith.constant 0 : index
    %c0_6 = arith.constant 0 : index
    %7 = vector.load %arg4[%c0_5, %c0_6] : memref<32x32xf32, #tpu.memory_space<vmem>>, vector<32x32xf32>
    %cst_7 = arith.constant dense<0.000000e+00> : vector<32x128xf32>
    %8 = tpu.matmul %7, %6, %cst_7 {dimension_numbers = #tpu.dot_dimension_numbers<[1], [0], [0], [1], [0, 0, 1, 1], [], []>} : vector<32x32xf32>, vector<32x128xf32>, vector<32x128xf32> -> vector<32x128xf32>
    %c0_8 = arith.constant 0 : index
    %c0_9 = arith.constant 0 : index
    %9 = vector.load %arg5[%c0_8, %c0_9] : memref<32x1xf32, #tpu.memory_space<vmem>>, vector<32x1xf32>
    %10 = vector.broadcast %9 : vector<32x1xf32> to vector<32x128xf32>
    %11 = arith.addf %8, %10 : vector<32x128xf32>
    %12 = math.tanh %11 : vector<32x128xf32>
    %c0_10 = arith.constant 0 : index
    %c0_11 = arith.constant 0 : index
    %13 = vector.load %arg6[%c0_10, %c0_11] : memref<32x32xf32, #tpu.memory_space<vmem>>, vector<32x32xf32>
    %cst_12 = arith.constant dense<0.000000e+00> : vector<32x128xf32>
    %14 = tpu.matmul %13, %12, %cst_12 {dimension_numbers = #tpu.dot_dimension_numbers<[1], [0], [0], [1], [0, 0, 1, 1], [], []>} : vector<32x32xf32>, vector<32x128xf32>, vector<32x128xf32> -> vector<32x128xf32>
    %c0_13 = arith.constant 0 : index
    %c0_14 = arith.constant 0 : index
    %15 = vector.load %arg7[%c0_13, %c0_14] : memref<32x1xf32, #tpu.memory_space<vmem>>, vector<32x1xf32>
    %16 = vector.broadcast %15 : vector<32x1xf32> to vector<32x128xf32>
    %17 = arith.addf %14, %16 : vector<32x128xf32>
    %18 = math.tanh %17 : vector<32x128xf32>
    %c0_15 = arith.constant 0 : index
    %c0_16 = arith.constant 0 : index
    %19 = vector.load %arg8[%c0_15, %c0_16] : memref<32x2xf32, #tpu.memory_space<vmem>>, vector<32x2xf32>
    %20 = vector.extract_strided_slice %19 {offsets = [0, 0], sizes = [32, 1], strides = [1, 1]} : vector<32x2xf32> to vector<32x1xf32>
    %21 = vector.broadcast %20 : vector<32x1xf32> to vector<32x128xf32>
    %22 = arith.mulf %21, %18 : vector<32x128xf32>
    %cst_17 = arith.constant dense<0.000000e+00> : vector<128xf32>
    %23 = vector.multi_reduction <add>, %22, %cst_17 [0] : vector<32x128xf32> to vector<128xf32>
    %24 = vector.shape_cast %23 : vector<128xf32> to vector<1x128xf32>
    %c0_18 = arith.constant 0 : index
    %c0_19 = arith.constant 0 : index
    %25 = vector.load %arg9[%c0_18, %c0_19] : memref<2x1xf32, #tpu.memory_space<vmem>>, vector<1x1xf32>
    %26 = vector.broadcast %25 : vector<1x1xf32> to vector<1x128xf32>
    %27 = arith.addf %24, %26 : vector<1x128xf32>
    %c0_20 = arith.constant 0 : index
    %c0_21 = arith.constant 0 : index
    %28 = vector.load %arg10[%c0_20, %c0_21] : memref<2x128xf32, #tpu.memory_space<vmem>>, vector<1x128xf32>
    tpu.vector_store %arg10[%c0_20, %c0_21], %27 {strides = array<i32>} : memref<2x128xf32, #tpu.memory_space<vmem>>, vector<1x128xf32>,
    %29 = vector.extract_strided_slice %19 {offsets = [0, 1], sizes = [32, 1], strides = [1, 1]} : vector<32x2xf32> to vector<32x1xf32>
    %30 = vector.broadcast %29 : vector<32x1xf32> to vector<32x128xf32>
    %31 = arith.mulf %30, %18 : vector<32x128xf32>
    %cst_22 = arith.constant dense<0.000000e+00> : vector<128xf32>
    %32 = vector.multi_reduction <add>, %31, %cst_22 [0] : vector<32x128xf32> to vector<128xf32>
    %33 = vector.shape_cast %32 : vector<128xf32> to vector<1x128xf32>
    %c1 = arith.constant 1 : index
    %c0_23 = arith.constant 0 : index
    %34 = vector.load %arg9[%c1, %c0_23] : memref<2x1xf32, #tpu.memory_space<vmem>>, vector<1x1xf32>
    %35 = vector.broadcast %34 : vector<1x1xf32> to vector<1x128xf32>
    %36 = arith.addf %33, %35 : vector<1x128xf32>
    %c1_24 = arith.constant 1 : index
    %c0_25 = arith.constant 0 : index
    %37 = vector.load %arg10[%c1_24, %c0_25] : memref<2x128xf32, #tpu.memory_space<vmem>>, vector<1x128xf32>
    tpu.vector_store %arg10[%c1_24, %c0_25], %36 {strides = array<i32>} : memref<2x128xf32, #tpu.memory_space<vmem>>, vector<1x128xf32>,
    return
  }
  func.func @transform_0(%arg0: i32) -> (i32, i32) {
    %c0_i32 = arith.constant 0 : i32
    %c0_i32_0 = arith.constant 0 : i32
    return %arg0, %c0_i32 : i32, i32
  }
  func.func @transform_1(%arg0: i32) -> (i32, i32) {
    %c0_i32 = arith.constant 0 : i32
    %c0_i32_0 = arith.constant 0 : i32
    %c0_i32_1 = arith.constant 0 : i32
    return %c0_i32, %c0_i32_0 : i32, i32
  }
  func.func @transform_2(%arg0: i32) -> (i32, i32) {
    %c0_i32 = arith.constant 0 : i32
    %c0_i32_0 = arith.constant 0 : i32
    %c0_i32_1 = arith.constant 0 : i32
    return %c0_i32, %c0_i32_0 : i32, i32
  }
  func.func @transform_3(%arg0: i32) -> (i32, i32) {
    %c0_i32 = arith.constant 0 : i32
    %c0_i32_0 = arith.constant 0 : i32
    %c0_i32_1 = arith.constant 0 : i32
    return %c0_i32, %c0_i32_0 : i32, i32
  }
  func.func @transform_4(%arg0: i32) -> (i32, i32) {
    %c0_i32 = arith.constant 0 : i32
    %c0_i32_0 = arith.constant 0 : i32
    %c0_i32_1 = arith.constant 0 : i32
    return %c0_i32, %c0_i32_0 : i32, i32
  }
  func.func @transform_5(%arg0: i32) -> (i32, i32) {
    %c0_i32 = arith.constant 0 : i32
    %c0_i32_0 = arith.constant 0 : i32
    %c0_i32_1 = arith.constant 0 : i32
    return %c0_i32, %c0_i32_0 : i32, i32
  }
  func.func @transform_6(%arg0: i32) -> (i32, i32) {
    %c0_i32 = arith.constant 0 : i32
    %c0_i32_0 = arith.constant 0 : i32
    %c0_i32_1 = arith.constant 0 : i32
    return %c0_i32, %c0_i32_0 : i32, i32
  }
  func.func @transform_7(%arg0: i32) -> (i32, i32) {
    %c0_i32 = arith.constant 0 : i32
    %c0_i32_0 = arith.constant 0 : i32
    %c0_i32_1 = arith.constant 0 : i32
    return %c0_i32, %c0_i32_0 : i32, i32
  }
  func.func @transform_8(%arg0: i32) -> (i32, i32) {
    %c0_i32 = arith.constant 0 : i32
    %c0_i32_0 = arith.constant 0 : i32
    %c0_i32_1 = arith.constant 0 : i32
    return %c0_i32, %c0_i32_0 : i32, i32
  }
  func.func @transform_9(%arg0: i32) -> (i32, i32) {
    %c0_i32 = arith.constant 0 : i32
    %c0_i32_0 = arith.constant 0 : i32
    return %c0_i32, %arg0 : i32, i32
  }
}

</mosaic_0001>

<bundles_post_ra>
// kernel: _particular_forward_impl.1
= control target key start
LH: loop header
LB: loop body
LE: loop exit
PB: predicated region body
PF: predicated region fallthrough
CT: control target
= control target key end

     0   :  { %vm77_vm0 = vcmask 15360   ;;  %s777_s0 = inlined_call_operand.vmem [shape: f32[101,2], index: 0, kind: input, shape index: {}]   ;;  %s778_s1 = inlined_call_operand.vmem [shape: f32[32,2], index: 1, kind: input, shape index: {}]   ;;  %s779_s2 = inlined_call_operand.vmem [shape: f32[32,1], index: 2, kind: input, shape index: {}]   ;;  %s780_s3 = inlined_call_operand.vmem [shape: f32[32,32], index: 3, kind: input, shape index: {}]   ;;  %s781_s4 = inlined_call_operand.vmem [shape: f32[32,1], index: 4, kind: input, shape index: {}]   ;;  %s782_s5 = inlined_call_operand.vmem [shape: f32[32,32], index: 5, kind: input, shape index: {}]   ;;  %s783_s6 = inlined_call_operand.vmem [shape: f32[32,1], index: 6, kind: input, shape index: {}]   ;;  %s784_s7 = inlined_call_operand.vmem [shape: f32[32,2], index: 7, kind: input, shape index: {}]   ;;  %s785_s8 = inlined_call_operand.vmem [shape: f32[2,1], index: 8, kind: input, shape index: {}]   ;;  %s786_s9 = inlined_call_operand.hbm [shape: f32[2,101], index: 9, kind: output, shape index: {}]  }
   0x1   :  { %v48_v0 = vld [vmem:[%s777_s0 + $0x78] sm:$0xff]  ;;  %v47_v1 = vld [vmem:[%s777_s0 + $0x70] sm:$0xff] }
   0x2   :  { %444 = vmatpush.xpose.msk.msra.mxu3 %vm77_vm0, %v48_v0  ;;  %416 = vmatpush.xpose.msk.msra.mxu0 %vm77_vm0, %v48_v0 }
   0x3   :  { %14 = vsyncpa [#allocation3], 0  ;;  %v54_v2 = vld [vmem:[%s779_s2 + $0x8] sm:$0xff]  ;;  %v519_v4 = vmov 0   ;;  %v45_v5 = vld [vmem:[%s777_s0 + $0x60] sm:$0xff]  ;;  %vm199_vm1 = vcmask 261120  }
   0x4   :  { %v46_v3 = vld [vmem:[%s777_s0 + $0x68] sm:$0xff]  ;;  %464 = vset.pattern.permute.xlu1 %v519_v4  ;;  %463 = vset.pattern.permute.xlu0 %v519_v4  ;;  %v53_v6 = vld [vmem:[%s779_s2] sm:$0xff]  ;;  %v44_v7 = vld [vmem:[%s777_s0 + $0x58] sm:$0xff] }
   0x5   :  { %64 = vperm.xlu1 %464, %v54_v2   ;;  %465 = vset.pattern.permute.xlu2 %v519_v4  ;;  %v43_v8 = vld [vmem:[%s777_s0 + $0x50] sm:$0xff]  ;;  %v175_v9 = vld [vmem:[%s781_s4] sm:$0xff]  ;;  %v42_v10 = vld [vmem:[%s777_s0 + $0x48] sm:$0xff] }
   0x6   :  { %445 = vmatpush.xpose.msk.msra.mxu3 %vm77_vm0, %v47_v1  ;;  %417 = vmatpush.xpose.msk.msra.mxu0 %vm77_vm0, %v47_v1  ;;  %v56_v11 = vld [vmem:[%s779_s2 + $0x18] sm:$0xff]  ;;  %v41_v12 = vld [vmem:[%s777_s0 + $0x40] sm:$0xff]  ;;  %v251_v13 = vld [vmem:[%s783_s6 + $0x10] sm:$0xff] }
   0x7   :  { %74 = vperm.xlu0 %463, %v56_v11   ;;  %v40_v14 = vld [vmem:[%s777_s0 + $0x38] sm:$0xff]  ;;  %v55_v15 = vld [vmem:[%s779_s2 + $0x10] sm:$0xff]  ;;  %v644_v17 = vld [vmem:[%s784_s7 + $0x8] sm:$0xff] }
   0x8   :  { %v39_v16 = vld [vmem:[%s777_s0 + $0x30] sm:$0xff]  ;;  %v38_v18 = vld [vmem:[%s777_s0 + $0x28] sm:$0xff]  ;;  %v37_v20 = vld [vmem:[%s777_s0 + $0x20] sm:$0xff] }
   0x9   :  { %v176_v19 = vld [vmem:[%s781_s4 + $0x8] sm:$0xff]  ;;  %v663_v21 = vld [vmem:[%s784_s7 + $0x10] sm:$0xff]  ;;  %v36_v22 = vld [vmem:[%s777_s0 + $0x18] sm:$0xff] }
   0xa   :  { %446 = vmatpush.xpose.msk.msra.mxu3 %vm77_vm0, %v46_v3  ;;  %418 = vmatpush.xpose.msk.msra.mxu0 %vm77_vm0, %v46_v3  ;;  %v250_v23 = vld [vmem:[%s783_s6 + $0x8] sm:$0xff]  ;;  %v35_v24 = vld [vmem:[%s777_s0 + $0x10] sm:$0xff]  ;;  %v682_v25 = vld [vmem:[%s784_s7 + $0x18] sm:$0xff] }
   0xb   :  { %v34_v26 = vld [vmem:[%s777_s0 + $0x8] sm:$0xff]  ;;  %v693_v27 = vld [vmem:[%s784_s7] sm:$0xff]  ;;  %v51_v32 = vld [vmem:[%s778_s1 + $0x10] sm:$0xff] }
   0xc   :  { %v33_v28 = vld [vmem:[%s777_s0] sm:$0xff]  ;;  %v50_v30 = vld [vmem:[%s778_s1 + $0x8] sm:$0xff]  ;;  %v52_v33 = vld [vmem:[%s778_s1 + $0x18] sm:$0xff] }
   0xd   :  { %59 = vperm.xlu1 %464, %v53_v6   ;;  %v392_v29 = vld [vmem:[%s785_s8 + $0x1] sm:$0x1]  ;;  %v178_v47 = vld [vmem:[%s781_s4 + $0x18] sm:$0xff]  ;;  %v177_v52 = vld [vmem:[%s781_s4 + $0x10] sm:$0xff] }
   0xe   :  { %447 = vmatpush.xpose.msk.msra.mxu3 %vm77_vm0, %v45_v5  ;;  %419 = vmatpush.xpose.msk.msra.mxu0 %vm77_vm0, %v45_v5  ;;  %v49_v31 = vld [vmem:[%s778_s1] sm:$0xff]  ;;  %v172_v53 = vld [vmem:[%s780_s3 + $0x8] sm:$0xff]  ;;  %v173_v55 = vld [vmem:[%s780_s3 + $0x10] sm:$0xff]  ;;  %s407_s1 = sshll.u32 %s786_s9, 4  ;;  %s408_s1 = int_to_ptr.hbm [resolvable:$true] %s407_s1 }
   0xf   :  { %69 = vperm.xlu0 %463, %v55_v15   ;;  %196 = vperm.xlu2 %465, %v178_v47   ;;  %v171_v50 = vld [vmem:[%s780_s3] sm:$0xff]  ;;  %v252_v56 = vld [vmem:[%s783_s6 + $0x18] sm:$0xff]  ;;  %v247_v15 = vld [vmem:[%s782_s5 + $0x10] sm:$0xff] }
  0x10   :  { %v249_v54 = vld [vmem:[%s783_s6] sm:$0xff]  ;;  %v174_v57 = vld [vmem:[%s780_s3 + $0x18] sm:$0xff] }
  0x11   :  { %v245_v11 = vld [vmem:[%s782_s5] sm:$0xff] }
  0x12   :  { %448 = vmatpush.xpose.msk.msra.mxu3 %vm77_vm0, %v44_v7  ;;  %420 = vmatpush.xpose.msk.msra.mxu0 %vm77_vm0, %v44_v7 }
  0x15   :  { %181 = vperm.xlu1 %464, %v175_v9  }
  0x16   :  { %449 = vmatpush.xpose.msk.msra.mxu3 %vm77_vm0, %v43_v8  ;;  %421 = vmatpush.xpose.msk.msra.mxu0 %vm77_vm0, %v43_v8  ;;  %v520_v8 = vmov 1  }
  0x17   :  { %186 = vperm.xlu0 %463, %v176_v19   ;;  %191 = vperm.xlu2 %465, %v177_v52  }
  0x1a   :  { %450 = vmatpush.xpose.msk.msra.mxu3 %vm77_vm0, %v42_v10  ;;  %422 = vmatpush.xpose.msk.msra.mxu0 %vm77_vm0, %v42_v10 }
  0x1d   :  { %265 = vperm.xlu1 %464, %v251_v13   ;;  %v355_v13 = vld [vmem:[%s785_s8] sm:$0x1] }
  0x1e   :  { %451 = vmatpush.xpose.msk.msra.mxu3 %vm77_vm0, %v41_v12  ;;  %423 = vmatpush.xpose.msk.msra.mxu0 %vm77_vm0, %v41_v12 }
  0x1f   :  { %260 = vperm.xlu0 %463, %v250_v23   ;;  %255 = vperm.xlu2 %465, %v249_v54  }
  0x22   :  { %452 = vmatpush.xpose.msk.msra.mxu3 %vm77_vm0, %v40_v14  ;;  %424 = vmatpush.xpose.msk.msra.mxu0 %vm77_vm0, %v40_v14  ;;  %v246_v14 = vld [vmem:[%s782_s5 + $0x8] sm:$0xff] }
  0x25   :  { %329 = vperm.xlu1 %464, %v644_v17  }
  0x26   :  { %453 = vmatpush.xpose.msk.msra.mxu3 %vm77_vm0, %v39_v16  ;;  %425 = vmatpush.xpose.msk.msra.mxu0 %vm77_vm0, %v39_v16 }
  0x27   :  { %324 = vperm.xlu0 %463, %v693_v27   ;;  %270 = vperm.xlu2 %465, %v252_v56  }
  0x2a   :  { %454 = vmatpush.xpose.msk.msra.mxu3 %vm77_vm0, %v38_v18  ;;  %426 = vmatpush.xpose.msk.msra.mxu0 %vm77_vm0, %v38_v18 }
  0x2d   :  { %334 = vperm.xlu1 %464, %v663_v21  }
  0x2e   :  { %455 = vmatpush.xpose.msk.msra.mxu3 %vm77_vm0, %v37_v20  ;;  %427 = vmatpush.xpose.msk.msra.mxu0 %vm77_vm0, %v37_v20 }
  0x2f   :  { %467 = vset.pattern.permute.xlu0 %v520_v8  ;;  %466 = vset.pattern.permute.xlu2 %v520_v8 }
  0x30   :  { %368 = vperm.xlu0 %467, %v644_v17   ;;  %364 = vperm.xlu2 %466, %v693_v27  }
  0x32   :  { %456 = vmatpush.xpose.msk.msra.mxu3 %vm77_vm0, %v36_v22  ;;  %428 = vmatpush.xpose.msk.msra.mxu0 %vm77_vm0, %v36_v22 }
  0x35   :  { %339 = vperm.xlu1 %464, %v682_v25  }
  0x36   :  { %457 = vmatpush.xpose.msk.msra.mxu3 %vm77_vm0, %v35_v24  ;;  %429 = vmatpush.xpose.msk.msra.mxu0 %vm77_vm0, %v35_v24 }
  0x38   :  { %468 = vset.pattern.permute.xlu0 %v519_v4  ;;  %372 = vperm.xlu2 %466, %v663_v21   ;;  %v248_v4 = vld [vmem:[%s782_s5 + $0x18] sm:$0xff]  ;;  %s521_s5 = smov [#allocation2]  }
  0x39   :  { %358 = vperm.xlu0 %468, %v355_v13   ;;  %s405_s26 = sshll.u32 %s521_s5, 4  ;;  %s406_s26 = int_to_ptr.vmem [resolvable:$true] %s405_s26 }
  0x3a   :  { %458 = vmatpush.xpose.msk.msra.mxu3 %vm77_vm0, %v34_v26  ;;  %430 = vmatpush.xpose.msk.msra.mxu0 %vm77_vm0, %v34_v26 }
  0x3d   :  { %395 = vperm.xlu1 %464, %v392_v29  }
  0x3e   :  { %459 = vmatpush.xpose.msk.msra.mxu3 %vm77_vm0, %v33_v28  ;;  %431 = vmatpush.xpose.msk.msra.mxu0 %vm77_vm0, %v33_v28 }
  0x40   :  { %376 = vperm.xlu2 %466, %v682_v25  }
  0x41   :  { %433 = vmatmul.msk.f32.vlgmr.msra.gmra.mxu3 %vm77_vm0, %v50_v30  ;;  %432 = vmatmul.msk.f32.vlgmr.msra.gmra.mxu0 %vm77_vm0, %v49_v31 }
  0x49   :  { %434 = vmatmul.msk.f32.gmra.mxu3 %vm77_vm0, %v51_v32 }
  0x51   :  { %435 = vmatmul.msk.f32.gmra.mxu3 %vm77_vm0, %v52_v33 }
  0x69   :  { %v197_v60 = vpop.permute.xlu2 %196 }
  0x71   :  { %v192_v62 = vpop.permute.xlu2 %191 }
  0x77   :  { %v65_v37 = vpop.permute.xlu1 %64 }
  0x79   :  { %v75_v35 = vpop.permute.xlu0 %74  ;;  %v256_v16 = vpop.permute.xlu2 %255 }
  0x7f   :  { %v60_v44 = vpop.permute.xlu1 %59 }
  0x81   :  { %v70_v38 = vpop.permute.xlu0 %69  ;;  %v271_v19 = vpop.permute.xlu2 %270 }
  0x87   :  { %v182_v5 = vpop.permute.xlu1 %181 }
  0x89   :  { %v187_v2 = vpop.permute.xlu0 %186 }
  0x8a   :  { %v365_v23 = vpop.permute.xlu2 %364 }
  0x8f   :  { %v266_v18 = vpop.permute.xlu1 %265 }
  0x91   :  { %v261_v20 = vpop.permute.xlu0 %260 }
  0x92   :  { %v373_v30 = vpop.permute.xlu2 %372 }
  0x97   :  { %v330_v22 = vpop.permute.xlu1 %329 }
  0x99   :  { %v325_v27 = vpop.permute.xlu0 %324 }
  0x9a   :  { %v377_v47 = vpop.permute.xlu2 %376 }
  0x9f   :  { %v335_v29 = vpop.permute.xlu1 %334 }
  0xa2   :  { %v369_v33 = vpop.permute.xlu0 %368 }
  0xbe   :  { %v155_v42 = vpop.f32.mrf.mxu0 }
  0xbf   :  { %v156_v45 = vadd.f32 %v155_v42, %v60_v44 }
  0xc4   :  { %v158_v34 = vpop.f32.mrf.mxu3 }
  0xc5   :  { %v159_v43 = vadd.f32 %v158_v34, %v65_v37 }
  0xcc   :  { %v161_v36 = vpop.f32.mrf.mxu3 }
  0xcd   :  { %v162_v40 = vadd.f32 %v161_v36, %v70_v38 }
  0xd4   :  { %v164_v39 = vpop.f32.mrf.mxu3 }
  0xd5   :  { %v165_v41 = vadd.f32 %v164_v39, %v75_v35 }
  0xd7   :  { %469 = vtanh.f32 %v165_v41 }
  0xd8   :  { %471 = vtanh.f32 %v162_v40 }
  0xd9   :  { %473 = vtanh.f32 %v159_v43 }
  0xda   :  { %475 = vtanh.f32 %v156_v45 }
  0xdd   :  { %v470_v46 = vpop.eup %469 }
  0xde   :  { %224 = vmatpush.msra.mxu1 %v470_v46  ;;  %v472_v48 = vpop.eup %471  ;;  %v340_v46 = vpop.permute.xlu1 %339 }
  0xdf   :  { %v474_v49 = vpop.eup %473 }
  0xe0   :  { %225 = vmatpush.msra.mxu1 %v472_v48  ;;  %v476_v51 = vpop.eup %475 }
  0xe2   :  { %226 = vmatpush.msra.mxu1 %v474_v49 }
  0xe4   :  { %227 = vmatpush.msra.mxu1 %v476_v51 }
  0xe5   :  { %436 = vmatmul.msk.f32.vlgmr.msra.gmra.mxu1 %vm199_vm1, %v171_v50 }
  0xed   :  { %437 = vmatmul.msk.f32.gmra.mxu1 %vm199_vm1, %v172_v53 }
  0xf5   :  { %438 = vmatmul.msk.f32.gmra.mxu1 %vm199_vm1, %v173_v55 }
  0xfd   :  { %439 = vmatmul.msk.f32.gmra.mxu1 %vm199_vm1, %v174_v57 }
 0x162   :  { %v229_v58 = vpop.f32.mrf.mxu1 }
 0x163   :  { %v230_v6 = vadd.f32 %v229_v58, %v182_v5 }
 0x16a   :  { %v232_v59 = vpop.f32.mrf.mxu1 }
 0x16b   :  { %v233_v3 = vadd.f32 %v232_v59, %v187_v2 }
 0x172   :  { %v235_v61 = vpop.f32.mrf.mxu1 }
 0x173   :  { %v236_v0 = vadd.f32 %v235_v61, %v192_v62 }
 0x17a   :  { %v238_v63 = vpop.f32.mrf.mxu1 }
 0x17b   :  { %v239_v1 = vadd.f32 %v238_v63, %v197_v60 }
 0x17d   :  { %477 = vtanh.f32 %v239_v1 }
 0x17e   :  { %479 = vtanh.f32 %v236_v0  ;;  %v359_v0 = vpop.permute.xlu0 %358 }
 0x17f   :  { %481 = vtanh.f32 %v233_v3  ;;  %v396_v3 = vpop.permute.xlu1 %395 }
 0x180   :  { %483 = vtanh.f32 %v230_v6 }
 0x183   :  { %v478_v7 = vpop.eup %477 }
 0x184   :  { %297 = vmatpush.msra.mxu2 %v478_v7  ;;  %v480_v9 = vpop.eup %479 }
 0x185   :  { %v482_v10 = vpop.eup %481 }
 0x186   :  { %298 = vmatpush.msra.mxu2 %v480_v9  ;;  %v484_v12 = vpop.eup %483 }
 0x188   :  { %299 = vmatpush.msra.mxu2 %v482_v10 }
 0x18a   :  { %300 = vmatpush.msra.mxu2 %v484_v12 }
 0x18b   :  { %440 = vmatmul.msk.f32.vlgmr.msra.gmra.mxu2 %vm199_vm1, %v245_v11 }
 0x193   :  { %441 = vmatmul.msk.f32.gmra.mxu2 %vm199_vm1, %v246_v14 }
 0x19b   :  { %442 = vmatmul.msk.f32.gmra.mxu2 %vm199_vm1, %v247_v15 }
 0x1a3   :  { %443 = vmatmul.msk.f32.gmra.mxu2 %vm199_vm1, %v248_v4 }
 0x20e   :  { %v302_v17 = vpop.f32.mrf.mxu2 }
 0x20f   :  { %v303_v25 = vadd.f32 %v302_v17, %v256_v16 }
 0x216   :  { %v305_v21 = vpop.f32.mrf.mxu2 }
 0x217   :  { %v306_v24 = vadd.f32 %v305_v21, %v261_v20 }
 0x219   :  { %485 = vtanh.f32 %v306_v24 }
 0x21a   :  { %487 = vtanh.f32 %v303_v25 }
 0x21e   :  { %v308_v26 = vpop.f32.mrf.mxu2 }
 0x21f   :  { %v309_v28 = vadd.f32 %v308_v26, %v266_v18  ;;  %v486_v32 = vpop.eup %485 }
 0x220   :  { %v488_v35 = vpop.eup %487  ;;  %v343_v37 = vmul.f32 %v486_v32, %v330_v22  ;;  %v380_v38 = vmul.f32 %v486_v32, %v369_v33 }
 0x221   :  { %489 = vtanh.f32 %v309_v28  ;;  %v342_v39 = vmul.f32 %v488_v35, %v325_v27  ;;  %v379_v40 = vmul.f32 %v488_v35, %v365_v23 }
 0x223   :  { %v346_v43 = vadd.f32 %v343_v37, %v342_v39  ;;  %v383_v44 = vadd.f32 %v380_v38, %v379_v40 }
 0x226   :  { %v311_v31 = vpop.f32.mrf.mxu2 }
 0x227   :  { %v312_v34 = vadd.f32 %v311_v31, %v271_v19  ;;  %v490_v36 = vpop.eup %489 }
 0x228   :  { %v344_v41 = vmul.f32 %v490_v36, %v335_v29  ;;  %v381_v42 = vmul.f32 %v490_v36, %v373_v30 }
 0x229   :  { %491 = vtanh.f32 %v312_v34 }
 0x22a   :  { %v347_v48 = vadd.f32 %v346_v43, %v344_v41  ;;  %v384_v49 = vadd.f32 %v383_v44, %v381_v42 }
 0x22f   :  { %v492_v45 = vpop.eup %491 }
 0x230   :  { %v345_v50 = vmul.f32 %v492_v45, %v340_v46  ;;  %v382_v51 = vmul.f32 %v492_v45, %v377_v47 }
 0x232   :  { %v385_v52 = vadd.f32 %v384_v49, %v382_v51  ;;  %v348_v53 = vadd.f32 %v347_v48, %v345_v50 }
 0x234   :  { %v386_v54 = vrot.slane %v385_v52, 4  ;;  %v349_v55 = vrot.slane %v348_v53, 4 }
 0x236   :  { %v387_v56 = vadd.f32 %v386_v54, %v385_v52  ;;  %v350_v57 = vadd.f32 %v349_v55, %v348_v53 }
 0x238   :  { %v351_v58 = vrot.slane %v350_v57, 2  ;;  %v388_v59 = vrot.slane %v387_v56, 2 }
 0x23a   :  { %v352_v60 = vadd.f32 %v351_v58, %v350_v57  ;;  %v389_v61 = vadd.f32 %v388_v59, %v387_v56 }
 0x23c   :  { %v353_v62 = vrot.slane %v352_v60, 1  ;;  %v390_v63 = vrot.slane %v389_v61, 1 }
 0x23e   :  { %v354_v1 = vadd.f32 %v353_v62, %v352_v60  ;;  %v391_v2 = vadd.f32 %v390_v63, %v389_v61 }
 0x240   :  { %v361_v5 = vadd.f32 %v359_v0, %v354_v1  ;;  %v398_v6 = vadd.f32 %v396_v3, %v391_v2 }
 0x242   :  { %362 = vst [vmem:[#allocation2] sm:$0x1] %v361_v5 }
 0x243   :  { %399 = vst [vmem:[#allocation2 + $0x1] sm:$0x1] %v398_v6 }
 0x244   :  { %410 = dma.vmem_to_hbm [thread:$0]  %s406_s26, 32, %s408_s1, [#allocation3]  }
 0x245   :  { %517 = dma.done.wait [#allocation3], 32  }
 0x246   :  { %518 = vsyncadd [#allocation3], 4294967264 }
 0x247   :  { %415 = vsyncpa [#allocation3], 1 }

</bundles_post_ra>
